<compile_context>
chip_gen: v7x
topology: tpu7x:2x2x1
jax: 0.10.0
libtpu: 0.0.40
codegen_flags: <defaults>
</compile_context>

<pallas_src>
import math

import jax
import jax.numpy as jnp
from jax.experimental import pallas as pl
from jax.experimental.pallas import tpu as pltpu


def _round_up(x, m):
    return ((x + m - 1) // m) * m


def _pick_tile(padded_dim, max_tile, granule):
    """Largest multiple-of-`granule` divisor of `padded_dim` that is <= max_tile."""
    best = granule
    t = granule
    limit = min(max_tile, padded_dim)
    while t <= limit:
        if padded_dim % t == 0:
            best = t
        t += granule
    return best


def _make_noisy_linear_kernel(tk, tn):
    """Kernel over grid = (batch tiles i, out tiles j, reduction tiles k)."""

    def kernel(x_ref, wmu_ref, wsig_ref, eps_in_ref, eps_out_ref, b_ref,
               o_ref, acc_ref):
        j = pl.program_id(1)
        k = pl.program_id(2)

        @pl.when(k == 0)
        def _():
            acc_ref[...] = jnp.zeros_like(acc_ref)

        compute_dtype = wmu_ref.dtype
        k_start = pl.multiple_of(k * tk, tk)
        j_start = pl.multiple_of(j * tn, tn)

        x = x_ref[...].astype(compute_dtype)                       # (tm, tk)
        eps_in = eps_in_ref[:, pl.ds(k_start, tk)]                 # (1, tk) f32
        xn = x * eps_in.astype(compute_dtype)                      # (tm, tk)
        eps_out = eps_out_ref[:, pl.ds(j_start, tn)]               # (1, tn) f32

        acc_ref[...] += (
            jnp.dot(x, wmu_ref[...], preferred_element_type=jnp.float32)
            + (jnp.dot(xn, wsig_ref[...], preferred_element_type=jnp.float32)
               * eps_out)
        )

        @pl.when(k == pl.num_programs(2) - 1)
        def _():
            b = b_ref[:, pl.ds(j_start, tn)]                       # (1, tn) f32
            o_ref[...] = (acc_ref[...] + b).astype(o_ref.dtype)

    return kernel


def prepare_noisy_linear(weight_mu, weight_sigma, eps_in, eps_out,
                         bias_mu, bias_sigma, bias_epsilon,
                         weight_dtype=None):
    """One-time (per reset_noise / param update) layout prep, hoisted out of
    the forward: transpose weights to (in, out), fold the bias, pad everything
    to (8, 128)-friendly shapes. Returned dict is what the forward consumes."""
    out_f, in_f = weight_mu.shape
    in_p = _round_up(in_f, 128)
    out_p = _round_up(out_f, 128)

    wdt = weight_dtype if weight_dtype is not None else weight_mu.dtype
    pad_w = ((0, in_p - in_f), (0, out_p - out_f))
    wmu_t = jnp.pad(weight_mu.T.astype(wdt), pad_w)
    wsig_t = jnp.pad(weight_sigma.T.astype(wdt), pad_w)

    b_eff = (bias_mu + bias_sigma * bias_epsilon).astype(jnp.float32)
    b_eff = jnp.pad(b_eff.reshape(1, out_f), ((0, 0), (0, out_p - out_f)))
    eps_in_p = jnp.pad(eps_in.astype(jnp.float32).reshape(1, in_f),
                       ((0, 0), (0, in_p - in_f)))
    eps_out_p = jnp.pad(eps_out.astype(jnp.float32).reshape(1, out_f),
                        ((0, 0), (0, out_p - out_f)))

    return dict(wmu_t=wmu_t, wsig_t=wsig_t, eps_in=eps_in_p, eps_out=eps_out_p,
                b_eff=b_eff, in_features=in_f, out_features=out_f,
                in_p=in_p, out_p=out_p)


def noisy_linear_forward(x, prepared, *, tm=None, tn=None, tk=None):
    """Pallas-backed NoisyLinear forward.

    x:        (..., in_features)
    prepared: output of `prepare_noisy_linear`
    returns:  (..., out_features)  in x.dtype
    """
    in_f = prepared["in_features"]
    out_f = prepared["out_features"]
    in_p = prepared["in_p"]
    out_p = prepared["out_p"]

    lead = x.shape[:-1]
    assert x.shape[-1] == in_f
    x2 = x.reshape(-1, in_f)
    B = x2.shape[0]
    B_p = _round_up(B, 8)

    # Tile selection: divisors of the 128-rounded dims (no over-padding).
    if tm is None:
        tm = B_p if B_p <= 512 else _pick_tile(B_p, 512, 8)
    if tn is None:
        tn = _pick_tile(out_p, 512, 128)
    if tk is None:
        tk = _pick_tile(in_p, 1024, 128)

    # v7x has 2 TensorCores per chip: when the whole batch fits in one tile,
    # split the out axis so the parallel grid has >= 2 steps.
    if (B_p // tm) * (out_p // tn) == 1 and out_p >= 256:
        tn = _pick_tile(out_p, out_p // 2, 128)

    x_p = jnp.pad(x2, ((0, B_p - B), (0, in_p - in_f)))
    grid = (B_p // tm, out_p // tn, in_p // tk)

    w_bytes = (prepared["wmu_t"].size * prepared["wmu_t"].dtype.itemsize
               + prepared["wsig_t"].size * prepared["wsig_t"].dtype.itemsize)
    cost = pl.CostEstimate(
        flops=4 * B_p * in_p * out_p,          # two matmuls, 2 flops / MAC
        transcendentals=0,
        bytes_accessed=(x_p.size * x_p.dtype.itemsize * (out_p // tn)
                        + w_bytes * (B_p // tm)
                        + B_p * out_p * x.dtype.itemsize),
    )

    out_padded = pl.pallas_call(
        _make_noisy_linear_kernel(tk, tn),
        out_shape=jax.ShapeDtypeStruct((B_p, out_p), x.dtype),
        grid_spec=pltpu.PrefetchScalarGridSpec(
            num_scalar_prefetch=0,
            grid=grid,
            in_specs=[
                pl.BlockSpec((tm, tk), lambda i, j, k: (i, k)),     # x
                pl.BlockSpec((tk, tn), lambda i, j, k: (k, j)),     # W_mu^T
                pl.BlockSpec((tk, tn), lambda i, j, k: (k, j)),     # W_sigma^T
                pl.BlockSpec((1, in_p), lambda i, j, k: (0, 0)),    # eps_in (VMEM-resident)
                pl.BlockSpec((1, out_p), lambda i, j, k: (0, 0)),   # eps_out (VMEM-resident)
                pl.BlockSpec((1, out_p), lambda i, j, k: (0, 0)),   # b_eff (VMEM-resident)
            ],
            out_specs=pl.BlockSpec((tm, tn), lambda i, j, k: (i, j)),
            scratch_shapes=[pltpu.VMEM((tm, tn), jnp.float32)],
        ),
        compiler_params=pltpu.CompilerParams(
            dimension_semantics=("parallel", "parallel", "arbitrary"),
            vmem_limit_bytes=32 * 1024 * 1024),
        cost_estimate=cost,
    )(x_p, prepared["wmu_t"], prepared["wsig_t"],
      prepared["eps_in"], prepared["eps_out"], prepared["b_eff"])

    return out_padded[:B, :out_f].reshape(*lead, out_f)


def scale_noise(key, size):
    """Factorized gaussian noise: sign(x) * sqrt(|x|)."""
    x = jax.random.normal(key, (size,), dtype=jnp.float32)
    return jnp.sign(x) * jnp.sqrt(jnp.abs(x))


def init_noisy_linear_params(key, in_features, out_features, std_init=0.5):
    """Replicates NoisyLinear.reset_parameters / reset_noise
    (per spec: mu ~ U(0, mu_range))."""
    k_wmu, k_bmu, k_eps_in, k_eps_out = jax.random.split(key, 4)
    mu_range = 1.0 / math.sqrt(in_features)

    weight_mu = jax.random.uniform(k_wmu, (out_features, in_features),
                                   minval=0.0, maxval=mu_range,
                                   dtype=jnp.float32)
    weight_sigma = jnp.full((out_features, in_features),
                            std_init / math.sqrt(in_features),
                            dtype=jnp.float32)
    bias_mu = jax.random.uniform(k_bmu, (out_features,),
                                 minval=0.0, maxval=mu_range,
                                 dtype=jnp.float32)
    bias_sigma = jnp.full((out_features,),
                          std_init / math.sqrt(out_features),
                          dtype=jnp.float32)

    eps_in = scale_noise(k_eps_in, in_features)
    eps_out = scale_noise(k_eps_out, out_features)
    # weight_epsilon (== outer(eps_out, eps_in)) is never materialized for the
    # kernel — only for the reference check in __main__.
    bias_epsilon = eps_out

    return dict(weight_mu=weight_mu, weight_sigma=weight_sigma,
                bias_mu=bias_mu, bias_sigma=bias_sigma,
                eps_in=eps_in, eps_out=eps_out, bias_epsilon=bias_epsilon)


def _reference(x, params):
    weight_epsilon = jnp.outer(params["eps_out"], params["eps_in"])
    w_eff = params["weight_mu"] + params["weight_sigma"] * weight_epsilon
    b_eff = params["bias_mu"] + params["bias_sigma"] * params["bias_epsilon"]
    return x @ w_eff.T + b_eff


if __name__ == "__main__":
    # --- case 1: nominal small shapes ----------------------------------
    in_features, out_features, batch = 32, 64, 8
    key = jax.random.PRNGKey(0)
    k_params, k_x = jax.random.split(key)

    params = init_noisy_linear_params(k_params, in_features, out_features,
                                      std_init=0.5)
    x = jax.random.normal(k_x, (batch, in_features), dtype=jnp.float32)

    prepared = prepare_noisy_linear(
        params["weight_mu"], params["weight_sigma"],
        params["eps_in"], params["eps_out"],
        params["bias_mu"], params["bias_sigma"], params["bias_epsilon"])

    out = jax.block_until_ready(noisy_linear_forward(x, prepared))
    ref = _reference(x, params)
    assert out.shape == (batch, out_features)
    assert jnp.allclose(out, ref, atol=2e-5, rtol=2e-5), \
        float(jnp.max(jnp.abs(out - ref)))

    # --- case 2: non-aligned shapes exercise the (8,128) padding path --
    in2, out2, b2 = 200, 72, 5
    k2p, k2x = jax.random.split(jax.random.PRNGKey(1))
    params2 = init_noisy_linear_params(k2p, in2, out2)
    x2 = jax.random.normal(k2x, (b2, in2), dtype=jnp.float32)
    prepared2 = prepare_noisy_linear(
        params2["weight_mu"], params2["weight_sigma"],
        params2["eps_in"], params2["eps_out"],
        params2["bias_mu"], params2["bias_sigma"], params2["bias_epsilon"])
    out2_ = jax.block_until_ready(noisy_linear_forward(x2, prepared2))
    ref2 = _reference(x2, params2)
    assert out2_.shape == (b2, out2)
    assert jnp.allclose(out2_, ref2, atol=2e-4, rtol=2e-4), \
        float(jnp.max(jnp.abs(out2_ - ref2)))

    # --- case 3: bf16 weight streaming (halved weight HBM traffic) -----
    prepared_bf16 = prepare_noisy_linear(
        params["weight_mu"], params["weight_sigma"],
        params["eps_in"], params["eps_out"],
        params["bias_mu"], params["bias_sigma"], params["bias_epsilon"],
        weight_dtype=jnp.bfloat16)
    out_bf16 = jax.block_until_ready(noisy_linear_forward(x, prepared_bf16))
    assert jnp.allclose(out_bf16, ref, atol=1e-1, rtol=1e-1)

    print("KERNEL_OK")
</pallas_src>

<mosaic_0001>
module attributes {stable_mosaic.version = 11 : i64} {
  func.func @kernel(%arg0: i32, %arg1: i32, %arg2: i32, %arg3: memref<8x128xf32, #tpu.memory_space<vmem>>, %arg4: memref<128x128xf32, #tpu.memory_space<vmem>>, %arg5: memref<128x128xf32, #tpu.memory_space<vmem>>, %arg6: memref<1x128xf32, #tpu.memory_space<vmem>>, %arg7: memref<1x128xf32, #tpu.memory_space<vmem>>, %arg8: memref<1x128xf32, #tpu.memory_space<vmem>>, %arg9: memref<8x128xf32, #tpu.memory_space<vmem>>, %arg10: memref<8x128xf32, #tpu.memory_space<vmem>>) attributes {dimension_semantics = [#tpu.dimension_semantics<parallel>, #tpu.dimension_semantics<parallel>, #tpu.dimension_semantics<arbitrary>], iteration_bounds = array<i64: 1, 1, 1>, scalar_prefetch = 0 : i64, scratch_operands = 1 : i64, tpu.core_type = #tpu.core_type<tc>, window_params = [{transform_indices = @transform_0, window_bounds = array<i64: 8, 128>}, {transform_indices = @transform_1, window_bounds = array<i64: 128, 128>}, {transform_indices = @transform_2, window_bounds = array<i64: 128, 128>}, {pipeline_mode = #tpu.pipeline_mode<synchronous>, transform_indices = @transform_3, window_bounds = array<i64: 1, 128>}, {pipeline_mode = #tpu.pipeline_mode<synchronous>, transform_indices = @transform_4, window_bounds = array<i64: 1, 128>}, {pipeline_mode = #tpu.pipeline_mode<synchronous>, transform_indices = @transform_5, window_bounds = array<i64: 1, 128>}, {transform_indices = @transform_6, window_bounds = array<i64: 8, 128>}]} {
    %c0_i32 = arith.constant 0 : i32
    %0 = arith.cmpi eq, %arg2, %c0_i32 : i32
    %1 = arith.extui %0 : i1 to i32
    %c0_i32_0 = arith.constant 0 : i32
    %2 = arith.cmpi ne, %1, %c0_i32_0 : i32
    scf.if %2 {
      %cst_16 = arith.constant 0.000000e+00 : f32
      %27 = vector.broadcast %cst_16 : f32 to vector<8x128xf32>
      %c0_17 = arith.constant 0 : index
      %c0_18 = arith.constant 0 : index
      %28 = vector.load %arg10[%c0_17, %c0_18] : memref<8x128xf32, #tpu.memory_space<vmem>>, vector<8x128xf32>
      tpu.vector_store %arg10[%c0_17, %c0_18], %27 {strides = array<i32>} : memref<8x128xf32, #tpu.memory_space<vmem>>, vector<8x128xf32>,
    } else {
    }
    %c128_i32 = arith.constant 128 : i32
    %3 = arith.muli %arg2, %c128_i32 : i32
    %4 = tpu.assume_multiple %3, 128 : i32
    %c128_i32_1 = arith.constant 128 : i32
    %5 = arith.muli %arg1, %c128_i32_1 : i32
    %6 = tpu.assume_multiple %5, 128 : i32
    %c0 = arith.constant 0 : index
    %c0_2 = arith.constant 0 : index
    %7 = vector.load %arg3[%c0, %c0_2] : memref<8x128xf32, #tpu.memory_space<vmem>>, vector<8x128xf32>
    %c0_3 = arith.constant 0 : index
    %8 = arith.index_cast %4 : i32 to index
    %9 = vector.load %arg6[%c0_3, %8] : memref<1x128xf32, #tpu.memory_space<vmem>>, vector<1x128xf32>
    %10 = vector.broadcast %9 : vector<1x128xf32> to vector<8x128xf32>
    %11 = arith.mulf %7, %10 : vector<8x128xf32>
    %c0_4 = arith.constant 0 : index
    %12 = arith.index_cast %6 : i32 to index
    %13 = vector.load %arg7[%c0_4, %12] : memref<1x128xf32, #tpu.memory_space<vmem>>, vector<1x128xf32>
    %c0_5 = arith.constant 0 : index
    %c0_6 = arith.constant 0 : index
    %14 = vector.load %arg10[%c0_5, %c0_6] : memref<8x128xf32, #tpu.memory_space<vmem>>, vector<8x128xf32>
    %c0_7 = arith.constant 0 : index
    %c0_8 = arith.constant 0 : index
    %15 = vector.load %arg4[%c0_7, %c0_8] : memref<128x128xf32, #tpu.memory_space<vmem>>, vector<128x128xf32>
    %cst = arith.constant dense<0.000000e+00> : vector<8x128xf32>
    %16 = tpu.matmul %7, %15, %cst {dimension_numbers = #tpu.dot_dimension_numbers<[1], [0], [0], [1], [0, 0, 1, 1], [], []>} : vector<8x128xf32>, vector<128x128xf32>, vector<8x128xf32> -> vector<8x128xf32>
    %c0_9 = arith.constant 0 : index
    %c0_10 = arith.constant 0 : index
    %17 = vector.load %arg5[%c0_9, %c0_10] : memref<128x128xf32, #tpu.memory_space<vmem>>, vector<128x128xf32>
    %cst_11 = arith.constant dense<0.000000e+00> : vector<8x128xf32>
    %18 = tpu.matmul %11, %17, %cst_11 {dimension_numbers = #tpu.dot_dimension_numbers<[1], [0], [0], [1], [0, 0, 1, 1], [], []>} : vector<8x128xf32>, vector<128x128xf32>, vector<8x128xf32> -> vector<8x128xf32>
    %19 = vector.broadcast %13 : vector<1x128xf32> to vector<8x128xf32>
    %20 = arith.mulf %18, %19 : vector<8x128xf32>
    %21 = arith.addf %16, %20 : vector<8x128xf32>
    %22 = arith.addf %14, %21 : vector<8x128xf32>
    %c0_12 = arith.constant 0 : index
    %c0_13 = arith.constant 0 : index
    %23 = vector.load %arg10[%c0_12, %c0_13] : memref<8x128xf32, #tpu.memory_space<vmem>>, vector<8x128xf32>
    tpu.vector_store %arg10[%c0_12, %c0_13], %22 {strides = array<i32>} : memref<8x128xf32, #tpu.memory_space<vmem>>, vector<8x128xf32>,
    %c0_i32_14 = arith.constant 0 : i32
    %24 = arith.cmpi eq, %arg2, %c0_i32_14 : i32
    %25 = arith.extui %24 : i1 to i32
    %c0_i32_15 = arith.constant 0 : i32
    %26 = arith.cmpi ne, %25, %c0_i32_15 : i32
    scf.if %26 {
      %c0_16 = arith.constant 0 : index
      %27 = arith.index_cast %6 : i32 to index
      %28 = vector.load %arg8[%c0_16, %27] : memref<1x128xf32, #tpu.memory_space<vmem>>, vector<1x128xf32>
      %c0_17 = arith.constant 0 : index
      %c0_18 = arith.constant 0 : index
      %29 = vector.load %arg10[%c0_17, %c0_18] : memref<8x128xf32, #tpu.memory_space<vmem>>, vector<8x128xf32>
      %30 = vector.broadcast %28 : vector<1x128xf32> to vector<8x128xf32>
      %31 = arith.addf %29, %30 : vector<8x128xf32>
      %c0_19 = arith.constant 0 : index
      %c0_20 = arith.constant 0 : index
      %32 = vector.load %arg9[%c0_19, %c0_20] : memref<8x128xf32, #tpu.memory_space<vmem>>, vector<8x128xf32>
      tpu.vector_store %arg9[%c0_19, %c0_20], %31 {strides = array<i32>} : memref<8x128xf32, #tpu.memory_space<vmem>>, vector<8x128xf32>,
    } else {
    }
    return
  }
  func.func @transform_0(%arg0: i32, %arg1: i32, %arg2: i32) -> (i32, i32) {
    %c0_i32 = arith.constant 0 : i32
    return %arg0, %arg2 : i32, i32
  }
  func.func @transform_1(%arg0: i32, %arg1: i32, %arg2: i32) -> (i32, i32) {
    %c0_i32 = arith.constant 0 : i32
    return %arg2, %arg1 : i32, i32
  }
  func.func @transform_2(%arg0: i32, %arg1: i32, %arg2: i32) -> (i32, i32) {
    %c0_i32 = arith.constant 0 : i32
    return %arg2, %arg1 : i32, i32
  }
  func.func @transform_3(%arg0: i32, %arg1: i32, %arg2: i32) -> (i32, i32) {
    %c0_i32 = arith.constant 0 : i32
    %c0_i32_0 = arith.constant 0 : i32
    %c0_i32_1 = arith.constant 0 : i32
    return %c0_i32, %c0_i32_0 : i32, i32
  }
  func.func @transform_4(%arg0: i32, %arg1: i32, %arg2: i32) -> (i32, i32) {
    %c0_i32 = arith.constant 0 : i32
    %c0_i32_0 = arith.constant 0 : i32
    %c0_i32_1 = arith.constant 0 : i32
    return %c0_i32, %c0_i32_0 : i32, i32
  }
  func.func @transform_5(%arg0: i32, %arg1: i32, %arg2: i32) -> (i32, i32) {
    %c0_i32 = arith.constant 0 : i32
    %c0_i32_0 = arith.constant 0 : i32
    %c0_i32_1 = arith.constant 0 : i32
    return %c0_i32, %c0_i32_0 : i32, i32
  }
  func.func @transform_6(%arg0: i32, %arg1: i32, %arg2: i32) -> (i32, i32) {
    %c0_i32 = arith.constant 0 : i32
    return %arg0, %arg1 : i32, i32
  }
}

</mosaic_0001>

<bundles_post_ra>
// kernel: tpu_custom_call.1
= control target key start
LH: loop header
LB: loop body
LE: loop exit
PB: predicated region body
PF: predicated region fallthrough
CT: control target
= control target key end

     0   :  { %11 = vsyncpa [#allocation4], 0  ;;  %s682_s0 = inlined_call_operand.hbm [shape: f32[8,128], index: 0, kind: input, shape index: {}]   ;;  %s683_s1 = inlined_call_operand.hbm [shape: f32[128,128], index: 1, kind: input, shape index: {}]   ;;  %s684_s2 = inlined_call_operand.hbm [shape: f32[128,128], index: 2, kind: input, shape index: {}]   ;;  %s685_s3 = inlined_call_operand.vmem [shape: f32[1,128], index: 3, kind: input, shape index: {}]   ;;  %s686_s4 = inlined_call_operand.vmem [shape: f32[1,128], index: 4, kind: input, shape index: {}]   ;;  %s687_s5 = inlined_call_operand.vmem [shape: f32[1,128], index: 5, kind: input, shape index: {}]   ;;  %s688_s6 = inlined_call_operand.hbm [shape: f32[8,128], index: 6, kind: output, shape index: {}]  }
   0x1   :  { %12 = vsyncpa [#allocation7], 0 }
   0x2   :  { %13 = vsyncpa [#allocation5], 0  ;;  %s559_s21 = smov [#allocation6]   ;;  %s465_s25 = scalar_lea.hbm %s683_s1, 2048 }
   0x3   :  { %s29_s22 = sshll.u32 %s559_s21, 4  ;;  %p466_p0 = scmp.ne.s32.totalorder %s683_s1, %s465_s25  ;;  %s30_s22 = int_to_ptr.vmem [resolvable:$true] %s29_s22 }
   0x4   :  { %p469_p1 = scmp.lt.u32.totalorder %s465_s25, %s683_s1 }
   0x6   :  { %p471_p2 = pnand %p469_p1, %p466_p0 }
   0x8   :  { %474 = shalt.err (!%p471_p2)
}
   0x9   :  { %s475_s30 = scalar_lea.vmem %s30_s22, 2048  ;;  %p480_p4 = scmp.lt.s32.totalorder %s30_s22, %s30_s22 }
   0xa   :  { %p476_p3 = scmp.ne.s32.totalorder %s30_s22, %s475_s30  ;;  %p481_p5 = scmp.lt.s32.totalorder %s475_s30, %s475_s30 }
   0xc   :  { %p482_p6 = por %p481_p5, %p480_p4 }
   0xe   :  { %p483_p7 = pnand %p482_p6, %p476_p3 }
  0x10   :  { %486 = shalt.err (!%p483_p7)
}
  0x11   :  { %s560_s7 = smov 128   ;;  %s561_s8 = smov 8  }
  0x12   :  { %35 = dma.hbm_to_vmem [thread:$0]  %s683_s1, 2048, %s30_s22, [#allocation7], %s560_s7, %s560_s7, %s561_s8  }
  0x13   :  { %s562_s11 = smov [#allocation3]   ;;  %s563_s13 = smov [#allocation8]  }
  0x14   :  { %s20_s12 = sshll.u32 %s562_s11, 4  ;;  %s41_s14 = sshll.u32 %s563_s13, 4  ;;  %s21_s12 = int_to_ptr.vmem [resolvable:$true] %s20_s12  ;;  %s42_s14 = int_to_ptr.vmem [resolvable:$true] %s41_s14 }
  0x15   :  { %s487_s17 = scalar_lea.hbm %s682_s0, 128 }
  0x16   :  { %p488_p8 = scmp.ne.s32.totalorder %s682_s0, %s487_s17  ;;  %p491_p9 = scmp.lt.u32.totalorder %s487_s17, %s682_s0 }
  0x18   :  { %p493_p10 = pnand %p491_p9, %p488_p8 }
  0x1a   :  { %496 = shalt.err (!%p493_p10)
}
  0x1b   :  { %s497_s1 = scalar_lea.vmem %s21_s12, 128  ;;  %p502_p12 = scmp.lt.s32.totalorder %s21_s12, %s21_s12 }
  0x1c   :  { %p498_p11 = scmp.ne.s32.totalorder %s21_s12, %s497_s1  ;;  %p503_p13 = scmp.lt.s32.totalorder %s497_s1, %s497_s1 }
  0x1e   :  { %p504_p0 = por %p503_p13, %p502_p12 }
  0x20   :  { %p505_p1 = pnand %p504_p0, %p498_p11 }
  0x22   :  { %508 = shalt.err (!%p505_p1)
}
  0x23   :  { %23 = dma.hbm_to_vmem [thread:$0]  %s682_s0, 128, %s21_s12, [#allocation4]  }
  0x24   :  { %s509_s26 = scalar_lea.hbm %s684_s2, 2048 }
  0x25   :  { %p510_p2 = scmp.ne.s32.totalorder %s684_s2, %s509_s26  ;;  %p513_p3 = scmp.lt.u32.totalorder %s509_s26, %s684_s2 }
  0x27   :  { %p515_p4 = pnand %p513_p3, %p510_p2 }
  0x29   :  { %518 = shalt.err (!%p515_p4)
}
  0x2a   :  { %s519_s9 = scalar_lea.vmem %s42_s14, 2048  ;;  %p524_p6 = scmp.lt.s32.totalorder %s42_s14, %s42_s14 }
  0x2b   :  { %p520_p5 = scmp.ne.s32.totalorder %s42_s14, %s519_s9  ;;  %p525_p7 = scmp.lt.s32.totalorder %s519_s9, %s519_s9 }
  0x2d   :  { %p526_p8 = por %p525_p7, %p524_p6 }
  0x2f   :  { %p527_p9 = pnand %p526_p8, %p520_p5 }
  0x31   :  { %530 = shalt.err (!%p527_p9)
}
  0x32   :  { %47 = dma.hbm_to_vmem [thread:$0]  %s684_s2, 2048, %s42_s14, [#allocation7], %s560_s7, %s560_s7, %s561_s8  }
  0x33   :  { %553 = dma.done.wait [#allocation4], 128  }
  0x34   :  { %554 = vsyncadd [#allocation4], 4294967168 }
  0x35   :  { %555 = dma.done.wait [#allocation7], 4096  }
  0x36   :  { %556 = vsyncadd [#allocation7], 4294963200  ;;  %v564_v0 = vmov 0.0|0.0   ;;  %vm565_vm0 = vmmov 0   ;;  %v566_v1 = vmov 0.0   ;;  %v103_v2 = vld [vmem:[#allocation8] sm:$0xff] }
  0x37   :  { %408 = vmatprep.subr.bf16.mxu0 %v564_v0  ;;  %432 = vmatprep.subr.bf16.mxu1 %v564_v0  ;;  %v104_v3 = vld [vmem:[#allocation8 + $0x8] sm:$0xff]  ;;  %v87_v4 = vld [vmem:[#allocation6] sm:$0xff]  ;;  %v105_v7 = vld [vmem:[#allocation8 + $0x10] sm:$0xff]  ;;  %s567_s13 = smov [#allocation9]  }
  0x38   :  { %370 = vmatprep.mubr.msk.f32.mxu0 %vm565_vm0, %v566_v1  ;;  %405 = vmatprep.mubr.msk.f32.mxu1 %vm565_vm0, %v566_v1  ;;  %v409_v5 = vpack.c.bf16 %v104_v3, %v103_v2  ;;  %v88_v6 = vld [vmem:[#allocation6 + $0x8] sm:$0xff]  ;;  %v106_v8 = vld [vmem:[#allocation8 + $0x18] sm:$0xff]  ;;  %v89_v10 = vld [vmem:[#allocation6 + $0x10] sm:$0xff]  ;;  %s288_s14 = sshll.u32 %s567_s13, 4  ;;  %s289_s14 = int_to_ptr.vmem [resolvable:$true] %s288_s14 }
  0x39   :  { %v433_v9 = vpack.c.bf16 %v88_v6, %v87_v4  ;;  %v90_v11 = vld [vmem:[#allocation6 + $0x18] sm:$0xff]  ;;  %v412_v12 = vpack.c.bf16 %v106_v8, %v105_v7  ;;  %v107_v14 = vld [vmem:[#allocation8 + $0x20] sm:$0xff]  ;;  %v108_v15 = vld [vmem:[#allocation8 + $0x28] sm:$0xff]  ;;  %s531_s15 = scalar_lea.vmem %s289_s14, 128  ;;  %p536_p11 = scmp.lt.s32.totalorder %s289_s14, %s289_s14 }
  0x3a   :  { %410 = vmatpush3.bf16.msra.mxu0 %v409_v5  ;;  %v436_v13 = vpack.c.bf16 %v90_v11, %v89_v10  ;;  %v91_v16 = vld [vmem:[#allocation6 + $0x20] sm:$0xff]  ;;  %v92_v17 = vld [vmem:[#allocation6 + $0x28] sm:$0xff]  ;;  %v415_v18 = vpack.c.bf16 %v108_v15, %v107_v14  ;;  %v109_v20 = vld [vmem:[#allocation8 + $0x30] sm:$0xff]  ;;  %p532_p10 = scmp.ne.s32.totalorder %s289_s14, %s531_s15  ;;  %p537_p12 = scmp.lt.s32.totalorder %s531_s15, %s531_s15 }
  0x3b   :  { %434 = vmatpush3.bf16.msra.mxu1 %v433_v9  ;;  %411 = vmatprep.subr.bf16.mxu0 %v564_v0  ;;  %v439_v19 = vpack.c.bf16 %v92_v17, %v91_v16  ;;  %v110_v21 = vld [vmem:[#allocation8 + $0x38] sm:$0xff]  ;;  %v93_v22 = vld [vmem:[#allocation6 + $0x30] sm:$0xff]  ;;  %v111_v26 = vld [vmem:[#allocation8 + $0x40] sm:$0xff] }
  0x3c   :  { %435 = vmatprep.subr.bf16.mxu1 %v564_v0  ;;  %v94_v23 = vld [vmem:[#allocation6 + $0x38] sm:$0xff]  ;;  %v418_v24 = vpack.c.bf16 %v110_v21, %v109_v20  ;;  %v112_v27 = vld [vmem:[#allocation8 + $0x48] sm:$0xff]  ;;  %v95_v28 = vld [vmem:[#allocation6 + $0x40] sm:$0xff]  ;;  %p538_p13 = por %p537_p12, %p536_p11 }
  0x3d   :  { %v442_v25 = vpack.c.bf16 %v94_v23, %v93_v22  ;;  %v96_v29 = vld [vmem:[#allocation6 + $0x48] sm:$0xff]  ;;  %v421_v30 = vpack.c.bf16 %v112_v27, %v111_v26  ;;  %v113_v32 = vld [vmem:[#allocation8 + $0x50] sm:$0xff]  ;;  %v114_v33 = vld [vmem:[#allocation8 + $0x58] sm:$0xff] }
  0x3e   :  { %413 = vmatpush3.bf16.msra.mxu0 %v412_v12  ;;  %v445_v31 = vpack.c.bf16 %v96_v29, %v95_v28  ;;  %v97_v34 = vld [vmem:[#allocation6 + $0x50] sm:$0xff]  ;;  %v98_v35 = vld [vmem:[#allocation6 + $0x58] sm:$0xff]  ;;  %v424_v36 = vpack.c.bf16 %v114_v33, %v113_v32  ;;  %v115_v38 = vld [vmem:[#allocation8 + $0x60] sm:$0xff]  ;;  %p539_p0 = pnand %p538_p13, %p532_p10 }
  0x3f   :  { %437 = vmatpush3.bf16.msra.mxu1 %v436_v13  ;;  %414 = vmatprep.subr.bf16.mxu0 %v564_v0  ;;  %v448_v37 = vpack.c.bf16 %v98_v35, %v97_v34  ;;  %v116_v39 = vld [vmem:[#allocation8 + $0x68] sm:$0xff]  ;;  %v99_v40 = vld [vmem:[#allocation6 + $0x60] sm:$0xff]  ;;  %v117_v44 = vld [vmem:[#allocation8 + $0x70] sm:$0xff] }
  0x40   :  { %438 = vmatprep.subr.bf16.mxu1 %v564_v0  ;;  %v100_v41 = vld [vmem:[#allocation6 + $0x68] sm:$0xff]  ;;  %v427_v42 = vpack.c.bf16 %v116_v39, %v115_v38  ;;  %v118_v45 = vld [vmem:[#allocation8 + $0x78] sm:$0xff]  ;;  %v101_v46 = vld [vmem:[#allocation6 + $0x70] sm:$0xff] }
  0x41   :  { %v451_v43 = vpack.c.bf16 %v100_v41, %v99_v40  ;;  %v102_v47 = vld [vmem:[#allocation6 + $0x78] sm:$0xff]  ;;  %v430_v48 = vpack.c.bf16 %v118_v45, %v117_v44 }
  0x42   :  { %416 = vmatpush3.bf16.msra.mxu0 %v415_v18  ;;  %v70_v49 = vld [vmem:[#allocation3] sm:$0xff]  ;;  %v454_v51 = vpack.c.bf16 %v102_v47, %v101_v46 }
  0x43   :  { %440 = vmatpush3.bf16.msra.mxu1 %v439_v19  ;;  %417 = vmatprep.subr.bf16.mxu0 %v564_v0  ;;  %v301_v50 = vld [vmem:[%s685_s3] ss:$0 sm:$0xff] }
  0x44   :  { %441 = vmatprep.subr.bf16.mxu1 %v564_v0  ;;  %v81_v52 = vmul.f32 %v301_v50, %v70_v49  ;;  %v302_v53 = vld [vmem:[%s686_s4] ss:$0 sm:$0xff] }
  0x45   :  { %v303_v58 = vld [vmem:[%s687_s5] ss:$0 sm:$0xff] }
  0x46   :  { %419 = vmatpush3.bf16.msra.mxu0 %v418_v24 }
  0x47   :  { %443 = vmatpush3.bf16.msra.mxu1 %v442_v25  ;;  %420 = vmatprep.subr.bf16.mxu0 %v564_v0 }
  0x48   :  { %444 = vmatprep.subr.bf16.mxu1 %v564_v0 }
  0x4a   :  { %422 = vmatpush3.bf16.msra.mxu0 %v421_v30 }
  0x4b   :  { %446 = vmatpush3.bf16.msra.mxu1 %v445_v31  ;;  %423 = vmatprep.subr.bf16.mxu0 %v564_v0 }
  0x4c   :  { %447 = vmatprep.subr.bf16.mxu1 %v564_v0 }
  0x4e   :  { %425 = vmatpush3.bf16.msra.mxu0 %v424_v36 }
  0x4f   :  { %449 = vmatpush3.bf16.msra.mxu1 %v448_v37  ;;  %426 = vmatprep.subr.bf16.mxu0 %v564_v0 }
  0x50   :  { %450 = vmatprep.subr.bf16.mxu1 %v564_v0 }
  0x52   :  { %428 = vmatpush3.bf16.msra.mxu0 %v427_v42 }
  0x53   :  { %452 = vmatpush3.bf16.msra.mxu1 %v451_v43  ;;  %429 = vmatprep.subr.bf16.mxu0 %v564_v0 }
  0x54   :  { %453 = vmatprep.subr.bf16.mxu1 %v564_v0 }
  0x56   :  { %431 = vmatpush3.bf16.msra.mxu0 %v430_v48 }
  0x57   :  { %455 = vmatpush3.bf16.msra.mxu1 %v454_v51 }
  0x59   :  { %371 = vmatmul.mubr.f32.vlgmr.msra.gmra.mrb[0].mxu0 %v81_v52 }
  0x5a   :  { %406 = vmatmul.mubr.f32.vlgmr.msra.gmra.mrb[0].mxu1 %v70_v49 }
 0x12c   :  { %v185_v54 = vpop.f32.mrb[0].mxu0 }
 0x12d   :  { %v195_v55 = vmul.f32 %v302_v53, %v185_v54  ;;  %v372_v56 = vpop.f32.mrb[1].mxu0  ;;  %v262_v57 = vpop.f32.mrb[0].mxu1 }
 0x12e   :  { %v407_v59 = vpop.f32.mrb[1].mxu1 }
 0x12f   :  { %v263_v60 = vadd.f32 %v262_v57, %v195_v55 }
 0x131   :  { %v280_v61 = vadd.f32 %v303_v58, %v263_v60 }
 0x133   :  { %281 = vst [vmem:[#allocation9] sm:$0xff] %v280_v61 }
 0x134   :  { %542 = shalt.err (!%p539_p0)
}
 0x135   :  { %s543_s17 = scalar_lea.hbm %s688_s6, 128 }
 0x136   :  { %p544_p1 = scmp.ne.s32.totalorder %s688_s6, %s543_s17  ;;  %p547_p2 = scmp.lt.u32.totalorder %s543_s17, %s688_s6 }
 0x138   :  { %p549_p3 = pnand %p547_p2, %p544_p1 }
 0x13a   :  { %552 = shalt.err (!%p549_p3)
}
 0x13b   :  { %291 = dma.vmem_to_hbm [thread:$0]  %s289_s14, 128, %s688_s6, [#allocation5]  }
 0x13c   :  { %557 = dma.done.wait [#allocation5], 128  }
 0x13d   :  { %558 = vsyncadd [#allocation5], 4294967168 }
 0x13e   :  { %295 = vsyncpa [#allocation4], 1 }
 0x13f   :  { %296 = vsyncpa [#allocation7], 1 }
 0x140   :  { %297 = vsyncpa [#allocation5], 1 }

</bundles_post_ra>
